<compile_context>
chip_gen: v6e
topology: v6e:2x2x1
jax: 0.10.0
libtpu: 0.0.40
codegen_flags: <defaults>
</compile_context>

<pallas_src>
import jax
import jax.numpy as jnp
from jax.experimental import pallas as pl
from jax.experimental.pallas import tpu as pltpu


def _attention_kernel(seg_ref, invc_ref, feat_ref, w_ref, out_ref,
                      seg_sum_ref, t_ref):
    gb = pl.program_id(0)   # graph-block index ("parallel" -> megacore on v7x)
    p = pl.program_id(1)    # pass: 0 = segment row-sums, 1 = scores + aggregation
    i = pl.program_id(2)    # node-tile index

    feats = feat_ref[...]                                   # (TN, H) f32
    g_blk = out_ref.shape[0]
    tn = feats.shape[0]

    # Per-tile membership mask: onehot[g, n] = 1 iff node n belongs to graph
    # gb*g_blk + g.  Recomputed per tile on the VPU; padded nodes (seg == -1)
    # and padded graphs match nothing, so padding is exact.
    gid = gb * g_blk + jax.lax.broadcasted_iota(jnp.int32, (g_blk, tn), 0)
    onehot = (seg_ref[...] == gid).astype(jnp.float32)      # (G_blk, TN)

    # ---- pass 0: segment row-sums (mean-before-matmul) ----------------------
    @pl.when(jnp.logical_and(p == 0, i == 0))
    def _():
        seg_sum_ref[...] = jnp.zeros_like(seg_sum_ref)

    @pl.when(p == 0)
    def _():
        seg_sum_ref[...] += jnp.dot(onehot, feats,
                                    preferred_element_type=jnp.float32)

    # ---- pass 1: t = tanh(mean @ W), per-node scores, weighted aggregation --
    @pl.when(jnp.logical_and(p == 1, i == 0))
    def _():
        # ctx_g = (sum_{i in g} emb_i / n_g) @ W  ==  mean(emb_g @ W, axis=0)
        ctx = jnp.dot(seg_sum_ref[...] * invc_ref[...], w_ref[...],
                      preferred_element_type=jnp.float32)   # (G_blk, H)
        t_ref[...] = jnp.tanh(ctx)                          # EUP
        out_ref[...] = jnp.zeros_like(out_ref)              # init resident output block

    @pl.when(p == 1)
    def _():
        # scoresT[g, n] = <t_g, feat_n>: contraction on the last dims is the
        # MXU-native rhs-transposed form -> no XLU transpose of the big feats tile.
        scoresT = jax.lax.dot_general(
            t_ref[...], feats, (((1,), (1,)), ((), ())),
            preferred_element_type=jnp.float32)             # (G_blk, TN)
        # rep_g += sum_{n in g} score_n * feat_n   (mask fused into the matmul)
        out_ref[...] += jnp.dot(onehot * scoresT, feats,
                                preferred_element_type=jnp.float32)


def _round_up(x, m):
    return (x + m - 1) // m * m


def attention_module_forward(features, weight, counts, *, node_tile=None):
    """features: (total_nodes, H) f32; weight: (H, H) f32; counts: (n_graphs,) int32.
    Returns (n_graphs, H) f32 graph-level representations."""
    total_nodes, hidden = features.shape
    n_graphs = int(counts.shape[0])

    # Guard against silent node/graph mis-assignment via jnp.repeat(total_repeat_length=...).
    try:
        assert int(jnp.sum(counts)) == total_nodes, \
            "sum(counts) must equal features.shape[0]"
    except jax.errors.ConcretizationTypeError:
        pass  # traced counts: caller is responsible

    # Graph-axis blocking (parallel grid axis -> v7x megacore when many graphs).
    g_blk = min(_round_up(n_graphs, 8), 128)
    g_pad = _round_up(n_graphs, g_blk)
    num_g_blocks = g_pad // g_blk

    # Node-axis tiling. Multi-tile requires the tile to be a multiple of 128
    # (lane rule for the (1, TN) seg block); a single full-extent tile is exempt.
    if node_tile is None:
        node_tile = 512 if total_nodes > 1024 else _round_up(total_nodes, 8)
    if node_tile < total_nodes:
        node_tile = _round_up(node_tile, 128)
        n_pad = _round_up(total_nodes, node_tile)
    else:
        node_tile = _round_up(total_nodes, 8)
        n_pad = node_tile
    num_node_tiles = n_pad // node_tile

    f32b = 4
    # Hidden dim stays UNPADDED (no 4x HBM inflation); only pad the node axis.
    feats_pad = jnp.zeros((n_pad, hidden), jnp.float32).at[:total_nodes, :].set(
        features.astype(jnp.float32))
    w_f32 = weight.astype(jnp.float32)

    # Per-node graph id; padded nodes get -1 so they match no graph.
    seg = jnp.repeat(jnp.arange(n_graphs, dtype=jnp.int32), counts,
                     total_repeat_length=total_nodes)
    seg_ids = jnp.full((1, n_pad), -1, jnp.int32).at[0, :total_nodes].set(seg)

    # Exact reciprocal of counts, clamped so empty graphs yield zero rows (no NaN).
    inv_counts = jnp.ones((g_pad, 1), jnp.float32).at[:n_graphs, 0].set(
        1.0 / jnp.maximum(counts, 1).astype(jnp.float32))

    # VMEM budget: double-buffered input/output blocks + scratch + live intermediates.
    vmem_need = (
        2 * node_tile * hidden * f32b        # feats tile (double-buffered)
        + 2 * node_tile * 4                  # seg tile
        + 2 * g_blk * f32b                   # inv_counts block
        + 2 * hidden * hidden * f32b         # weight block
        + 2 * g_blk * hidden * f32b          # output block
        + 2 * g_blk * hidden * f32b          # seg_sum + t scratch
        + 2 * g_blk * node_tile * f32b       # onehot / masked-score intermediates
    )
    vmem_limit = int(min(max(2 * vmem_need, 4 << 20), 48 << 20))

    flops = int(6 * g_pad * n_pad * hidden + 2 * g_pad * hidden * hidden)
    transcendentals = int(g_pad * hidden)
    bytes_accessed = int(
        num_g_blocks * 2 * n_pad * hidden * f32b   # feats streamed twice per graph block
        + num_g_blocks * 2 * n_pad * 4             # seg ids
        + hidden * hidden * f32b                   # weight
        + g_pad * hidden * f32b + g_pad * f32b)    # output + reciprocal counts

    out_pad = pl.pallas_call(
        _attention_kernel,
        out_shape=jax.ShapeDtypeStruct((g_pad, hidden), jnp.float32),
        grid_spec=pltpu.PrefetchScalarGridSpec(
            num_scalar_prefetch=0,
            grid=(num_g_blocks, 2, num_node_tiles),
            in_specs=[
                pl.BlockSpec((1, node_tile), lambda g, p, i: (0, i)),       # seg ids
                pl.BlockSpec((g_blk, 1), lambda g, p, i: (g, 0)),           # 1/counts
                pl.BlockSpec((node_tile, hidden), lambda g, p, i: (i, 0)),  # features
                pl.BlockSpec((hidden, hidden), lambda g, p, i: (0, 0)),     # weight
            ],
            out_specs=pl.BlockSpec((g_blk, hidden), lambda g, p, i: (g, 0)),
            scratch_shapes=[
                pltpu.VMEM((g_blk, hidden), jnp.float32),   # per-graph row sums
                pltpu.VMEM((g_blk, hidden), jnp.float32),   # tanh(context)
            ],
        ),
        compiler_params=pltpu.CompilerParams(
            dimension_semantics=("parallel", "arbitrary", "arbitrary"),
            vmem_limit_bytes=vmem_limit),
        cost_estimate=pl.CostEstimate(
            flops=flops, transcendentals=transcendentals,
            bytes_accessed=bytes_accessed),
    )(seg_ids, inv_counts, feats_pad, w_f32)

    return out_pad[:n_graphs, :]


def _reference(features, weight, starts, counts):
    """Pure-JAX reference matching the PyTorch forward loop."""
    reps = []
    for s, c in zip(list(starts), list(counts)):
        emb = features[int(s):int(s) + int(c), :]
        ctx = jnp.mean(emb @ weight, axis=0)
        t = jnp.tanh(ctx)
        scores = emb @ t[:, None]                # (n_g, 1)
        reps.append((emb.T @ scores).T[0])       # (H,)
    return jnp.stack(reps, axis=0)


def _run_case(key, hidden_dim, nodes_per_graph, node_tile=None):
    n_graphs = len(nodes_per_graph)
    total_nodes = sum(nodes_per_graph)
    k_feat, k_w = jax.random.split(key)

    features = jax.random.normal(k_feat, (total_nodes, hidden_dim), dtype=jnp.float32)
    # Deterministic Xavier-uniform init for weight_matrix (H, H).
    bound = (6.0 / (hidden_dim + hidden_dim)) ** 0.5
    weight = jax.random.uniform(
        k_w, (hidden_dim, hidden_dim), minval=-bound, maxval=bound, dtype=jnp.float32)

    counts = jnp.array(nodes_per_graph, dtype=jnp.int32)
    starts = jnp.concatenate(
        [jnp.zeros((1,), jnp.int32), jnp.cumsum(counts)[:-1]]).astype(jnp.int32)

    out = attention_module_forward(features, weight, counts, node_tile=node_tile)
    out = jax.block_until_ready(out)

    ref = _reference(features, weight, starts, counts)
    assert out.shape == (n_graphs, hidden_dim)
    assert jnp.allclose(out, ref, atol=1e-4, rtol=5e-4), "mismatch vs reference"


if __name__ == "__main__":
    key = jax.random.PRNGKey(0)
    k1, k2 = jax.random.split(key)

    # Case 1: module-sized toy problem (single node tile).
    _run_case(k1, hidden_dim=32, nodes_per_graph=[5, 7])

    # Case 2: exercises the tiled two-pass accumulation path (3 node tiles of 128).
    _run_case(k2, hidden_dim=32, nodes_per_graph=[70, 90, 100], node_tile=128)

    print("KERNEL_OK")
</pallas_src>

<mosaic_0001>
module attributes {stable_mosaic.version = 11 : i64} {
  func.func @_attention_kernel(%arg0: i32, %arg1: i32, %arg2: i32, %arg3: memref<1x16xi32, #tpu.memory_space<vmem>>, %arg4: memref<8x1xf32, #tpu.memory_space<vmem>>, %arg5: memref<16x32xf32, #tpu.memory_space<vmem>>, %arg6: memref<32x32xf32, #tpu.memory_space<vmem>>, %arg7: memref<8x32xf32, #tpu.memory_space<vmem>>, %arg8: memref<8x32xf32, #tpu.memory_space<vmem>>, %arg9: memref<8x32xf32, #tpu.memory_space<vmem>>) attributes {dimension_semantics = [#tpu.dimension_semantics<parallel>, #tpu.dimension_semantics<arbitrary>, #tpu.dimension_semantics<arbitrary>], iteration_bounds = array<i64: 1, 2, 1>, scalar_prefetch = 0 : i64, scratch_operands = 2 : i64, tpu.core_type = #tpu.core_type<tc>, window_params = [{transform_indices = @transform_0, window_bounds = array<i64: 1, 16>}, {transform_indices = @transform_1, window_bounds = array<i64: 8, 1>}, {transform_indices = @transform_2, window_bounds = array<i64: 16, 32>}, {pipeline_mode = #tpu.pipeline_mode<synchronous>, transform_indices = @transform_3, window_bounds = array<i64: 32, 32>}, {transform_indices = @transform_4, window_bounds = array<i64: 8, 32>}]} {
    %c0 = arith.constant 0 : index
    %c0_0 = arith.constant 0 : index
    %0 = vector.load %arg5[%c0, %c0_0] : memref<16x32xf32, #tpu.memory_space<vmem>>, vector<16x32xf32>
    %c8_i32 = arith.constant 8 : i32
    %1 = arith.muli %arg0, %c8_i32 : i32
    %2 = tpu.iota {dimensions = array<i32: 0>} : vector<8x16xi32>
    %3 = vector.broadcast %1 : i32 to vector<8x16xi32>
    %4 = arith.addi %3, %2 : vector<8x16xi32>
    %c0_1 = arith.constant 0 : index
    %c0_2 = arith.constant 0 : index
    %5 = vector.load %arg3[%c0_1, %c0_2] : memref<1x16xi32, #tpu.memory_space<vmem>>, vector<1x16xi32>
    %6 = vector.broadcast %5 : vector<1x16xi32> to vector<8x16xi32>
    %7 = arith.cmpi eq, %6, %4 : vector<8x16xi32>
    %8 = arith.extui %7 : vector<8x16xi1> to vector<8x16xi32>
    %9 = arith.sitofp %8 : vector<8x16xi32> to vector<8x16xf32>
    %c0_i32 = arith.constant 0 : i32
    %10 = arith.cmpi eq, %arg1, %c0_i32 : i32
    %c0_i32_3 = arith.constant 0 : i32
    %11 = arith.cmpi eq, %arg2, %c0_i32_3 : i32
    %12 = arith.andi %10, %11 : i1
    %13 = arith.extui %12 : i1 to i32
    %c0_i32_4 = arith.constant 0 : i32
    %14 = arith.cmpi ne, %13, %c0_i32_4 : i32
    scf.if %14 {
      %cst = arith.constant 0.000000e+00 : f32
      %26 = vector.broadcast %cst : f32 to vector<8x32xf32>
      %c0_11 = arith.constant 0 : index
      %c0_12 = arith.constant 0 : index
      %27 = vector.load %arg8[%c0_11, %c0_12] : memref<8x32xf32, #tpu.memory_space<vmem>>, vector<8x32xf32>
      tpu.vector_store %arg8[%c0_11, %c0_12], %26 {strides = array<i32>} : memref<8x32xf32, #tpu.memory_space<vmem>>, vector<8x32xf32>,
    } else {
    }
    %c0_i32_5 = arith.constant 0 : i32
    %15 = arith.cmpi eq, %arg1, %c0_i32_5 : i32
    %16 = arith.extui %15 : i1 to i32
    %c0_i32_6 = arith.constant 0 : i32
    %17 = arith.cmpi ne, %16, %c0_i32_6 : i32
    scf.if %17 {
      %c0_11 = arith.constant 0 : index
      %c0_12 = arith.constant 0 : index
      %26 = vector.load %arg8[%c0_11, %c0_12] : memref<8x32xf32, #tpu.memory_space<vmem>>, vector<8x32xf32>
      %cst = arith.constant dense<0.000000e+00> : vector<8x32xf32>
      %27 = tpu.matmul %9, %0, %cst {dimension_numbers = #tpu.dot_dimension_numbers<[1], [0], [0], [1], [0, 0, 1, 1], [], []>} : vector<8x16xf32>, vector<16x32xf32>, vector<8x32xf32> -> vector<8x32xf32>
      %28 = arith.addf %26, %27 : vector<8x32xf32>
      %c0_13 = arith.constant 0 : index
      %c0_14 = arith.constant 0 : index
      %29 = vector.load %arg8[%c0_13, %c0_14] : memref<8x32xf32, #tpu.memory_space<vmem>>, vector<8x32xf32>
      tpu.vector_store %arg8[%c0_13, %c0_14], %28 {strides = array<i32>} : memref<8x32xf32, #tpu.memory_space<vmem>>, vector<8x32xf32>,
    } else {
    }
    %c1_i32 = arith.constant 1 : i32
    %18 = arith.cmpi eq, %arg1, %c1_i32 : i32
    %c0_i32_7 = arith.constant 0 : i32
    %19 = arith.cmpi eq, %arg2, %c0_i32_7 : i32
    %20 = arith.andi %18, %19 : i1
    %21 = arith.extui %20 : i1 to i32
    %c0_i32_8 = arith.constant 0 : i32
    %22 = arith.cmpi ne, %21, %c0_i32_8 : i32
    scf.if %22 {
      %c0_11 = arith.constant 0 : index
      %c0_12 = arith.constant 0 : index
      %26 = vector.load %arg8[%c0_11, %c0_12] : memref<8x32xf32, #tpu.memory_space<vmem>>, vector<8x32xf32>
      %c0_13 = arith.constant 0 : index
      %c0_14 = arith.constant 0 : index
      %27 = vector.load %arg4[%c0_13, %c0_14] : memref<8x1xf32, #tpu.memory_space<vmem>>, vector<8x1xf32>
      %28 = vector.broadcast %27 : vector<8x1xf32> to vector<8x32xf32>
      %29 = arith.mulf %26, %28 : vector<8x32xf32>
      %c0_15 = arith.constant 0 : index
      %c0_16 = arith.constant 0 : index
      %30 = vector.load %arg6[%c0_15, %c0_16] : memref<32x32xf32, #tpu.memory_space<vmem>>, vector<32x32xf32>
      %cst = arith.constant dense<0.000000e+00> : vector<8x32xf32>
      %31 = tpu.matmul %29, %30, %cst {dimension_numbers = #tpu.dot_dimension_numbers<[1], [0], [0], [1], [0, 0, 1, 1], [], []>} : vector<8x32xf32>, vector<32x32xf32>, vector<8x32xf32> -> vector<8x32xf32>
      %32 = math.tanh %31 : vector<8x32xf32>
      %c0_17 = arith.constant 0 : index
      %c0_18 = arith.constant 0 : index
      %33 = vector.load %arg9[%c0_17, %c0_18] : memref<8x32xf32, #tpu.memory_space<vmem>>, vector<8x32xf32>
      tpu.vector_store %arg9[%c0_17, %c0_18], %32 {strides = array<i32>} : memref<8x32xf32, #tpu.memory_space<vmem>>, vector<8x32xf32>,
      %cst_19 = arith.constant 0.000000e+00 : f32
      %34 = vector.broadcast %cst_19 : f32 to vector<8x32xf32>
      %c0_20 = arith.constant 0 : index
      %c0_21 = arith.constant 0 : index
      %35 = vector.load %arg7[%c0_20, %c0_21] : memref<8x32xf32, #tpu.memory_space<vmem>>, vector<8x32xf32>
      tpu.vector_store %arg7[%c0_20, %c0_21], %34 {strides = array<i32>} : memref<8x32xf32, #tpu.memory_space<vmem>>, vector<8x32xf32>,
    } else {
    }
    %c1_i32_9 = arith.constant 1 : i32
    %23 = arith.cmpi eq, %arg1, %c1_i32_9 : i32
    %24 = arith.extui %23 : i1 to i32
    %c0_i32_10 = arith.constant 0 : i32
    %25 = arith.cmpi ne, %24, %c0_i32_10 : i32
    scf.if %25 {
      %c0_11 = arith.constant 0 : index
      %c0_12 = arith.constant 0 : index
      %26 = vector.load %arg9[%c0_11, %c0_12] : memref<8x32xf32, #tpu.memory_space<vmem>>, vector<8x32xf32>
      %cst = arith.constant dense<0.000000e+00> : vector<8x16xf32>
      %27 = tpu.matmul %26, %0, %cst {dimension_numbers = #tpu.dot_dimension_numbers<[1], [1], [0], [0], [0, 0, 1, 0], [], []>} : vector<8x32xf32>, vector<16x32xf32>, vector<8x16xf32> -> vector<8x16xf32>
      %c0_13 = arith.constant 0 : index
      %c0_14 = arith.constant 0 : index
      %28 = vector.load %arg7[%c0_13, %c0_14] : memref<8x32xf32, #tpu.memory_space<vmem>>, vector<8x32xf32>
      %29 = arith.mulf %9, %27 : vector<8x16xf32>
      %cst_15 = arith.constant dense<0.000000e+00> : vector<8x32xf32>
      %30 = tpu.matmul %29, %0, %cst_15 {dimension_numbers = #tpu.dot_dimension_numbers<[1], [0], [0], [1], [0, 0, 1, 1], [], []>} : vector<8x16xf32>, vector<16x32xf32>, vector<8x32xf32> -> vector<8x32xf32>
      %31 = arith.addf %28, %30 : vector<8x32xf32>
      %c0_16 = arith.constant 0 : index
      %c0_17 = arith.constant 0 : index
      %32 = vector.load %arg7[%c0_16, %c0_17] : memref<8x32xf32, #tpu.memory_space<vmem>>, vector<8x32xf32>
      tpu.vector_store %arg7[%c0_16, %c0_17], %31 {strides = array<i32>} : memref<8x32xf32, #tpu.memory_space<vmem>>, vector<8x32xf32>,
    } else {
    }
    return
  }
  func.func @transform_0(%arg0: i32, %arg1: i32, %arg2: i32) -> (i32, i32) {
    %c0_i32 = arith.constant 0 : i32
    %c0_i32_0 = arith.constant 0 : i32
    return %c0_i32, %arg2 : i32, i32
  }
  func.func @transform_1(%arg0: i32, %arg1: i32, %arg2: i32) -> (i32, i32) {
    %c0_i32 = arith.constant 0 : i32
    %c0_i32_0 = arith.constant 0 : i32
    return %arg0, %c0_i32 : i32, i32
  }
  func.func @transform_2(%arg0: i32, %arg1: i32, %arg2: i32) -> (i32, i32) {
    %c0_i32 = arith.constant 0 : i32
    %c0_i32_0 = arith.constant 0 : i32
    return %arg2, %c0_i32 : i32, i32
  }
  func.func @transform_3(%arg0: i32, %arg1: i32, %arg2: i32) -> (i32, i32) {
    %c0_i32 = arith.constant 0 : i32
    %c0_i32_0 = arith.constant 0 : i32
    %c0_i32_1 = arith.constant 0 : i32
    return %c0_i32, %c0_i32_0 : i32, i32
  }
  func.func @transform_4(%arg0: i32, %arg1: i32, %arg2: i32) -> (i32, i32) {
    %c0_i32 = arith.constant 0 : i32
    %c0_i32_0 = arith.constant 0 : i32
    return %arg0, %c0_i32 : i32, i32
  }
}

</mosaic_0001>

<bundles_post_ra>
// kernel: tpu_custom_call.1
= control target key start
LH: loop header
LB: loop body
LE: loop exit
PB: predicated region body
PF: predicated region fallthrough
CT: control target
= control target key end

     0   :  { %9 = vsyncpa [#allocation5], 0  ;;  %s1133_s0 = inlined_call_operand.vmem [shape: s32[1,16], index: 0, kind: input, shape index: {}]   ;;  %s1134_s1 = inlined_call_operand.vmem [shape: f32[8,1], index: 1, kind: input, shape index: {}]   ;;  %s1135_s2 = inlined_call_operand.hbm [shape: f32[16,32], index: 2, kind: input, shape index: {}]   ;;  %s1136_s3 = inlined_call_operand.hbm [shape: f32[32,32], index: 3, kind: input, shape index: {}]   ;;  %s1137_s4 = inlined_call_operand.hbm [shape: f32[8,32], index: 4, kind: output, shape index: {}]  }
   0x1   :  { %10 = vsyncpa [#allocation8], 0 }
   0x2   :  { %11 = vsyncpa [#allocation6], 0  ;;  %s1009_s15 = smov 0   ;;  %s1011_s16 = smov 0  }
   0x3   :  { %s1013_s17 = smov 0  }
   0x4 LB: > { %s719_s18 = sadd.s32 4294967295, %s968_s17   ;;  %s32_s19 = sadd.s32 1, %s964_s16  ;;  %s968_s17 = sphi %s1013_s17, %s17_s17   ;;  %s964_s16 = sphi %s1011_s16, %s1143_s16   ;;  %s960_s15 = sphi %s1009_s15, %s1142_s15  }
   0x5   : > { %p34_p0 = scmp.ge.s32.totalorder %s32_s19, 2  ;;  %p720_p1 = scmp.ge.s32.totalorder %s968_s17, 1 }
   0x6   : > { %p166_p2 = scmp.lt.s32.totalorder %s968_s17, 3  ;;  %p1036_p4 = scmp.eq.s32.totalorder %s719_s18, 0 }
   0x7   : > { %s1145_s19 = smov (%p34_p0, %s32_s19), 0  ;;  %s970_s22 = smov [#allocation4]  }
   0x8   : > { %p1030_p3 = pnand %p720_p1, %p166_p2  ;;  %s194_s23 = sshll.u32 %s970_s22, 4  ;;  %s195_s23 = int_to_ptr.vmem [resolvable:$true] %s194_s23 }
   0x9   : > { %s971_s25 = smov [#allocation7]   ;;  %s869_s27 = scalar_lea.vmem %s195_s23, 256 }
   0xa   : > { %p804_p5 = pneg %p1030_p3  ;;  %s207_s26 = sshll.u32 %s971_s25, 4  ;;  %s208_s26 = int_to_ptr.vmem [resolvable:$true] %s207_s26 }
   0xb   : > { %p870_p8 = scmp.ne.s32.totalorder %s195_s23, %s869_s27  ;;  %p877_p11 = scmp.lt.s32.totalorder %s195_s23, %s195_s23 }
   0xc   : > { %p1044_p6 = pnand %p1036_p4, %p804_p5  ;;  %p878_p12 = scmp.lt.s32.totalorder %s869_s27, %s869_s27 }
   0xe   : > { %p860_p7 = pneg %p1044_p6  ;;  %p879_p13 = por %p878_p12, %p877_p11 }
  0x10   : > { %p872_p9 = pnand %p870_p8, %p860_p7 }
  0x12   : > { %p873_p10 = pneg %p872_p9 }
  0x14   : > { %p880_p0 = pnand %p879_p13, %p873_p10 }
  0x16   : > { %883 = shalt.err (!%p880_p0)
}
  0x17   : > { %s972_s28 = smov 128   ;;  %s973_s29 = smov 8  }
  0x18   : > { %807 = dma.hbm_to_vmem [thread:$0]  (!%p1044_p6), %s1135_s2, 256, %s195_s23, [#allocation5], %s972_s28, %s972_s28, %s973_s29  }
  0x19   : > { %s895_s6 = scalar_lea.vmem %s208_s26, 512  ;;  %p903_p8 = scmp.lt.s32.totalorder %s208_s26, %s208_s26 }
  0x1a   : > { %p896_p1 = scmp.ne.s32.totalorder %s208_s26, %s895_s6  ;;  %p904_p9 = scmp.lt.s32.totalorder %s895_s6, %s895_s6 }
  0x1c   : > { %p898_p2 = pnand %p896_p1, %p860_p7  ;;  %p905_p11 = por %p904_p9, %p903_p8 }
  0x1e   : > { %p899_p5 = pneg %p898_p2 }
  0x20   : > { %p906_p10 = pnand %p905_p11, %p899_p5 }
  0x22   : > { %909 = shalt.err (!%p906_p10)
}
  0x23   : > { %810 = dma.hbm_to_vmem [thread:$0]  (!%p1044_p6), %s1136_s3, 512, %s208_s26, [#allocation8], %s972_s28, %s972_s28, %s973_s29  }
  0x24   : > { %223 = sbr.rel (%p1030_p3) target bundleno = 1018 (0x3fa), region = 36 }
  0x29   : > { %947 = dma.done.wait (%p1036_p4), [#allocation5], 256  }
  0x2a   : > { %949 = vsyncadd (%p1036_p4), [#allocation5], 4294967040 }
  0x2b   : > { %951 = dma.done.wait (%p1036_p4), [#allocation8], 512  }
  0x2c   : > { %953 = vsyncadd (%p1036_p4), [#allocation8], 4294966784  ;;  %v261_v0 = vlaneseq  ;;  %p273_p7 = scmp.eq.s32.totalorder %s960_s15, 0  ;;  %v1077_v2 = vld [vmem:[#allocation4] sm:$0xff]  ;;  %v1079_v3 = vld [vmem:[#allocation4 + $0x8] sm:$0xff]  ;;  %v974_v5 = vmov 0.0  }
  0x2d   : > { %v728_v4 = vld [vmem:[%s1133_s0] ss:$0 sm:$0xff]  ;;  %vm279_vm1 = vcmask (%p273_p7), 261120   ;;  %v975_v7 = vmov (%p273_p7), 0.0  }
  0x2e   : > { %v262_v1 = vshrl.u32 %v261_v0, 7  ;;  %278 = sbr.rel (!%p273_p7) target bundleno = 51 (0x33), region = 48  ;;  %280 = vst.msk [vmem:[#allocation2] sm:$0xff] (%p273_p7), %vm279_vm1, %v975_v7 }
  0x30   : > { %vm270_vm0 = vcmp.eq.s32.totalorder %v728_v4, %v262_v1 }
  0x31   : > { %v1084_v6 = vsel %vm270_vm0, 1.0, %v974_v5 }
  0x33 PF: > { %p731_p3 = scmp.ne.s32.totalorder %s960_s15, 0 }
  0x35   : > { %283 = sbr.rel (%p731_p3) target bundleno = 259 (0x103), region = 52 }
  0x3a   : > { %v976_v8 = vmov 0.0   ;;  %vm977_vm2 = vmmov 0   ;;  %vm285_vm3 = vcmask 130048   ;;  %v284_v9 = vld [vmem:[#allocation2] sm:$0xff]  ;;  %vm360_vm4 = vcmask 261120  }
  0x3b   : > { %760 = vmatprep.subr.mxu0 %v976_v8  ;;  %764 = vmatprep.mubr.msk.f32.mxu0 %vm977_vm2, %v976_v8 }
  0x3c   : > { %761 = vmatpush3.msra.mxu0 %v1079_v3 }
  0x3d   : > { %762 = vmatprep.subr.mxu0 %v976_v8 }
  0x3e   : > { %763 = vmatpush3.msra.mxu0 %v1077_v2 }
  0x3f   : > { %765 = vmatmul.mubr.msk.f32.vlgmr.msra.gmra.mxu0 %vm285_vm3, %v1084_v6 }
  0xff   : > { %v355_v10 = vpop.f32.mrf.mxu0 }
 0x100   : > { %v359_v11 = vadd.f32 %v355_v10, %v284_v9 }
 0x101   : > { %v766_v12 = vpop.f32.mrf.mxu0 }
 0x102   : > { %361 = vst.msk [vmem:[#allocation2] sm:$0xff] %vm360_vm4, %v359_v11 }
 0x103 PF: > { %p362_p4 = scmp.eq.s32.totalorder %s960_s15, 1 }
 0x104   : > { %v368_v13 = vld [vmem:[%s1134_s1] sm:$0xff] (%p362_p4)  ;;  %v378_v14 = vld [vmem:[#allocation7 + $0x18] sm:$0xff] (%p362_p4)  ;;  %v978_v15 = vmov (%p362_p4), 0   ;;  %v979_v16 = vmov (%p362_p4), 0.0   ;;  %v377_v17 = vld [vmem:[#allocation7 + $0x10] sm:$0xff] (%p362_p4)  ;;  %vm379_vm5 = vcmask (%p362_p4), 261120  }
 0x105   : > { %366 = sbr.rel (!%p362_p4) target bundleno = 596 (0x254), region = 56  ;;  %855 = vset.pattern.permute.xlu0 (%p362_p4), %v978_v15  ;;  %767 = vmatprep.subr.mxu0 (%p362_p4), %v979_v16  ;;  %455 = vst.msk [vmem:[#allocation9] sm:$0xff] (%p362_p4), %vm379_vm5, %v979_v16  ;;  %v376_v18 = vld [vmem:[#allocation7 + $0x8] sm:$0xff] (%p362_p4)  ;;  %vm980_vm6 = vmmov (%p362_p4), 0   ;;  %v375_v19 = vld [vmem:[#allocation7] sm:$0xff] (%p362_p4) }
 0x106   : > { %371 = vperm.xlu0 (%p362_p4), %855, %v368_v13   ;;  %768 = vmatpush3.msra.mxu0 (%p362_p4), %v378_v14 }
 0x107   : > { %769 = vmatprep.subr.mxu0 (%p362_p4), %v979_v16  ;;  %775 = vmatprep.mubr.msk.f32.mxu0 (%p362_p4), %vm980_vm6, %v979_v16 }
 0x108   : > { %770 = vmatpush3.msra.mxu0 (%p362_p4), %v377_v17 }
 0x109   : > { %771 = vmatprep.subr.mxu0 (%p362_p4), %v979_v16  ;;  %v367_v20 = vld [vmem:[#allocation2] sm:$0xff] (%p362_p4) }
 0x10a   : > { %772 = vmatpush3.msra.mxu0 %v376_v18 }
 0x10b   : > { %773 = vmatprep.subr.mxu0 %v979_v16 }
 0x10c   : > { %774 = vmatpush3.msra.mxu0 %v375_v19 }
 0x181   : > { %v372_v21 = vpop.permute.xlu0 %371 }
 0x182   : > { %v374_v22 = vmul.f32 %v372_v21, %v367_v20 }
 0x184   : > { %776 = vmatmul.mubr.msk.f32.vlgmr.msra.gmra.mxu0 %vm379_vm5, %v374_v22 }
 0x244   : > { %v449_v23 = vpop.f32.mrf.mxu0 }
 0x245   : > { %856 = vtanh.f32 %v449_v23 }
 0x246   : > { %v777_v24 = vpop.f32.mrf.mxu0 }
 0x252   : > { %v857_v25 = vpop.eup %856 }
 0x253   : > { %454 = vst.msk [vmem:[#allocation3] sm:$0xff] %vm379_vm5, %v857_v25 }
 0x254 PF: > { %p735_p6 = scmp.ne.s32.totalorder %s960_s15, 1 }
 0x256   : > { %458 = sbr.rel (%p735_p6) target bundleno = 1003 (0x3eb), region = 60 }
 0x25b   : > { %vm460_vm7 = vcmask 261120   ;;  %v981_v26 = vmov 0.0   ;;  %vm982_vm8 = vmmov 0   ;;  %v459_v27 = vld [vmem:[#allocation3] sm:$0xff]  ;;  %vm542_vm9 = vcmask 130048   ;;  %v540_v31 = vld [vmem:[#allocation9] sm:$0xff] }
 0x25c   : > { %778 = vmatprep.subr.mxu0 %v981_v26  ;;  %782 = vmatprep.mubr.msk.f32.mxu0 %vm982_vm8, %v981_v26 }
 0x25d   : > { %779 = vmatpush3.xpose.msk.msra.mxu0 %vm460_vm7, %v1079_v3  ;;  %785 = vmatprep.subr.mxu1 %v981_v26 }
 0x25e   : > { %780 = vmatprep.subr.mxu0 %v981_v26  ;;  %786 = vmatpush3.msra.mxu1 %v1079_v3 }
 0x25f   : > { %787 = vmatprep.subr.mxu1 %v981_v26  ;;  %789 = vmatprep.mubr.msk.f32.mxu1 %vm982_vm8, %v981_v26 }
 0x260   : > { %788 = vmatpush3.msra.mxu1 %v1077_v2 }
 0x261   : > { %781 = vmatpush3.xpose.msk.msra.mxu0 %vm460_vm7, %v1077_v2 }
 0x264   : > { %783 = vmatmul.mubr.msk.f32.vlgmr.msra.gmra.mxu0 %vm460_vm7, %v459_v27 }
 0x324   : > { %v536_v28 = vpop.f32.mrf.mxu0 }
 0x325   : > { %v541_v29 = vmul.f32 %v1084_v6, %v536_v28 }
 0x326   : > { %v784_v30 = vpop.f32.mrf.mxu0 }
 0x327   : > { %790 = vmatmul.mubr.msk.f32.vlgmr.msra.gmra.mxu1 %vm542_vm9, %v541_v29 }
 0x3e7   : > { %v612_v32 = vpop.f32.mrf.mxu1 }
 0x3e8   : > { %v616_v33 = vadd.f32 %v612_v32, %v540_v31 }
 0x3e9   : > { %v791_v34 = vpop.f32.mrf.mxu1 }
 0x3ea   : > { %617 = vst.msk [vmem:[#allocation9] sm:$0xff] %vm460_vm7, %v616_v33 }
 0x3eb PF: > { %p1109_p12 = scmp.eq.s32.totalorder %s719_s18, 1  ;;  %s983_s14 = smov [#allocation9]  }
 0x3ec   : > { %s627_s15 = sshll.u32 %s983_s14, 4  ;;  %s628_s15 = int_to_ptr.vmem [resolvable:$true] %s627_s15 }
 0x3ed   : > { %s910_s20 = scalar_lea.vmem %s628_s15, 128  ;;  %p917_p2 = scmp.lt.s32.totalorder %s628_s15, %s628_s15 }
 0x3ee   : > { %p911_p13 = scmp.ne.s32.totalorder %s628_s15, %s910_s20  ;;  %p918_p5 = scmp.lt.s32.totalorder %s910_s20, %s910_s20 }
 0x3f0   : > { %p912_p0 = pnand %p911_p13, %p1109_p12  ;;  %p919_p8 = por %p918_p5, %p917_p2 }
 0x3f2   : > { %p913_p1 = pneg %p912_p0 }
 0x3f4   : > { %p920_p9 = pnand %p919_p8, %p913_p1 }
 0x3f6   : > { %923 = shalt.err (!%p920_p9)
}
 0x3f7   : > { %801 = dma.vmem_to_hbm [thread:$0]  (%p1109_p12), %s628_s15, 128, %s1137_s4, [#allocation6]  }
 0x3f8   : > { %955 = dma.done.wait (%p1109_p12), [#allocation6], 128  }
 0x3f9   : > { %957 = vsyncadd (%p1109_p12), [#allocation6], 4294967168 }
 0x3fa PF: > { %s17_s17 = sadd.s32 1, %s968_s17   ;;  %s1142_s15 = smov %s964_s16 }
 0x3fb   : > { %p14_p11 = scmp.ge.s32.totalorder %s17_s17, 4   ;;  %s1143_s16 = smov %s1145_s19 }
 0x3fd   :  { %16 = sbr.rel (!%p14_p11) target bundleno = 4 (0x4), region = 93 }
 0x402   :  { %640 = vsyncpa [#allocation5], 1 }
 0x403   :  { %642 = vsyncpa [#allocation5 + $0x1], 1 }
 0x404   :  { %643 = vsyncpa [#allocation8], 1 }
 0x405   :  { %644 = vsyncpa [#allocation6], 1 }
 0x406   :  { %646 = vsyncpa [#allocation6 + $0x1], 1 }

</bundles_post_ra>
